<compile_context>
chip_gen: v5e
topology: v5e:2x2
jax: 0.10.0
libtpu: 0.0.40
codegen_flags: <defaults>
</compile_context>

<pallas_src>
import math

import jax
import jax.numpy as jnp
from jax.experimental import pallas as pl
from jax.experimental.pallas import tpu as pltpu

OUT_RAW = 28 * 28          # 784
OUT_PAD = 896              # 7 * 128 : lane-dense padded output width
HIDDEN = 256
LATENT = 32


def decoder_kernel(x_ref, w1_ref, b1_ref, w2_ref, b2_ref, o_ref):
    # hidden = ReLU(x @ W1 + b1)  (bf16 inputs, f32 accumulate)
    h = jnp.dot(x_ref[...], w1_ref[...], preferred_element_type=jnp.float32)
    h = jnp.maximum(h + b1_ref[...], 0.0)
    # out = Sigmoid(h @ W2 + b2)  (bf16 inputs, f32 accumulate, f32 epilogue)
    y = jnp.dot(h.astype(jnp.bfloat16), w2_ref[...],
                preferred_element_type=jnp.float32)
    o_ref[...] = jax.nn.sigmoid(y + b2_ref[...])


def decoder_forward(x, w1, b1, w2, b2, *, tb=256):
    """x: (B, 32) float32 -> (B, 1, 28, 28) float32 (same semantics as the
    PyTorch forward)."""
    B = x.shape[0]

    # --- wrapper-side layout prep (done once per call; cheap XLA ops) ---
    # Weights to bf16; pad second layer's output dim 784 -> 896 with zeros.
    w1_bf = w1.astype(jnp.bfloat16)                                    # (32, 256)
    b1_f = b1.astype(jnp.float32).reshape(1, HIDDEN)                   # (1, 256)
    w2_p = jnp.zeros((HIDDEN, OUT_PAD), jnp.float32).at[:, :OUT_RAW].set(w2)
    w2_bf = w2_p.astype(jnp.bfloat16)                                  # (256, 896)
    b2_p = jnp.zeros((1, OUT_PAD), jnp.float32).at[:, :OUT_RAW].set(
        b2.reshape(1, OUT_RAW))                                        # (1, 896)

    # Batch tile: at least one full 8-row sublane group, up to `tb` rows.
    TB = tb if B >= tb else max(8, ((B + 7) // 8) * 8)
    Bp = pl.cdiv(B, TB) * TB
    x_p = x if Bp == B else jnp.pad(x, ((0, Bp - B), (0, 0)))
    x_bf = x_p.astype(jnp.bfloat16)                                    # (Bp, 32)

    grid = (Bp // TB,)

    cost = pl.CostEstimate(
        flops=2 * Bp * (LATENT * HIDDEN + HIDDEN * OUT_PAD),
        transcendentals=Bp * OUT_PAD,
        bytes_accessed=(x_bf.size * 2 + w1_bf.size * 2 + w2_bf.size * 2
                        + b1_f.size * 4 + b2_p.size * 4 + Bp * OUT_PAD * 4),
    )

    out_padded = pl.pallas_call(
        decoder_kernel,
        out_shape=jax.ShapeDtypeStruct((Bp, OUT_PAD), jnp.float32),
        grid=grid,
        in_specs=[
            pl.BlockSpec((TB, LATENT), lambda i: (i, 0)),       # x tile per step
            pl.BlockSpec((LATENT, HIDDEN), lambda i: (0, 0)),   # w1 (resident)
            pl.BlockSpec((1, HIDDEN), lambda i: (0, 0)),        # b1 (resident)
            pl.BlockSpec((HIDDEN, OUT_PAD), lambda i: (0, 0)),  # w2 (resident)
            pl.BlockSpec((1, OUT_PAD), lambda i: (0, 0)),       # b2 (resident)
        ],
        out_specs=pl.BlockSpec((TB, OUT_PAD), lambda i: (i, 0)),
        compiler_params=pltpu.CompilerParams(
            dimension_semantics=("parallel",),       # shards batch across TCs on v7x
            vmem_limit_bytes=32 * 1024 * 1024,       # safe on v5e/v6e/v7x scoped VMEM
        ),
        cost_estimate=cost,
    )(x_bf, w1_bf, b1_f, w2_bf, b2_p)

    # Drop batch + lane padding, then same semantics as `.view(-1, 1, 28, 28)`.
    return out_padded[:B, :OUT_RAW].reshape(-1, 1, 28, 28)


def init_params(key):
    """Deterministic init mimicking torch.nn.Linear default (U(-1/sqrt(fan_in), +))."""
    k1, k2, k3, k4 = jax.random.split(key, 4)
    bound1 = 1.0 / math.sqrt(float(LATENT))
    bound2 = 1.0 / math.sqrt(float(HIDDEN))
    w1 = jax.random.uniform(k1, (LATENT, HIDDEN), jnp.float32, -bound1, bound1)
    b1 = jax.random.uniform(k2, (1, HIDDEN), jnp.float32, -bound1, bound1)
    w2 = jax.random.uniform(k3, (HIDDEN, OUT_RAW), jnp.float32, -bound2, bound2)
    b2 = jax.random.uniform(k4, (1, OUT_RAW), jnp.float32, -bound2, bound2)
    return w1, b1, w2, b2


if __name__ == "__main__":
    key = jax.random.PRNGKey(0)
    k_params, k_x = jax.random.split(key)
    w1, b1, w2, b2 = init_params(k_params)

    B = 2  # small batch (padded to 8 rows inside the wrapper)
    x = jax.random.normal(k_x, (B, LATENT), jnp.float32)

    out = decoder_forward(x, w1, b1, w2, b2)
    jax.block_until_ready(out)

    # Sanity check against a pure-JAX f32 reference of the same forward pass.
    # bf16 weights/activations feeding the MXU (f32 accumulate) -> loosen atol.
    h_ref = jnp.maximum(x @ w1 + b1, 0.0)
    ref = jax.nn.sigmoid(h_ref @ w2 + b2).reshape(-1, 1, 28, 28)
    assert out.shape == (B, 1, 28, 28)
    assert jnp.allclose(out, ref, atol=2e-2), "mismatch vs reference"

    print("KERNEL_OK")
</pallas_src>

<mosaic_0001>
module attributes {stable_mosaic.version = 11 : i64} {
  func.func @decoder_kernel(%arg0: i32, %arg1: memref<8x32xbf16, #tpu.memory_space<vmem>>, %arg2: memref<32x256xbf16, #tpu.memory_space<vmem>>, %arg3: memref<1x256xf32, #tpu.memory_space<vmem>>, %arg4: memref<256x896xbf16, #tpu.memory_space<vmem>>, %arg5: memref<1x896xf32, #tpu.memory_space<vmem>>, %arg6: memref<8x896xf32, #tpu.memory_space<vmem>>) attributes {dimension_semantics = [#tpu.dimension_semantics<parallel>], iteration_bounds = array<i64: 1>, scalar_prefetch = 0 : i64, scratch_operands = 0 : i64, tpu.core_type = #tpu.core_type<tc>, window_params = [{transform_indices = @transform_0, window_bounds = array<i64: 8, 32>}, {pipeline_mode = #tpu.pipeline_mode<synchronous>, transform_indices = @transform_1, window_bounds = array<i64: 32, 256>}, {pipeline_mode = #tpu.pipeline_mode<synchronous>, transform_indices = @transform_2, window_bounds = array<i64: 1, 256>}, {pipeline_mode = #tpu.pipeline_mode<synchronous>, transform_indices = @transform_3, window_bounds = array<i64: 256, 896>}, {pipeline_mode = #tpu.pipeline_mode<synchronous>, transform_indices = @transform_4, window_bounds = array<i64: 1, 896>}, {transform_indices = @transform_5, window_bounds = array<i64: 8, 896>}]} {
    %c0 = arith.constant 0 : index
    %c0_0 = arith.constant 0 : index
    %0 = vector.load %arg1[%c0, %c0_0] : memref<8x32xbf16, #tpu.memory_space<vmem>>, vector<8x32xbf16>
    %c0_1 = arith.constant 0 : index
    %c0_2 = arith.constant 0 : index
    %1 = vector.load %arg2[%c0_1, %c0_2] : memref<32x256xbf16, #tpu.memory_space<vmem>>, vector<32x256xbf16>
    %cst = arith.constant dense<0.000000e+00> : vector<8x256xf32>
    %2 = tpu.matmul %0, %1, %cst {dimension_numbers = #tpu.dot_dimension_numbers<[1], [0], [0], [1], [0, 0, 1, 1], [], []>} : vector<8x32xbf16>, vector<32x256xbf16>, vector<8x256xf32> -> vector<8x256xf32>
    %c0_3 = arith.constant 0 : index
    %c0_4 = arith.constant 0 : index
    %3 = vector.load %arg3[%c0_3, %c0_4] : memref<1x256xf32, #tpu.memory_space<vmem>>, vector<1x256xf32>
    %4 = vector.broadcast %3 : vector<1x256xf32> to vector<8x256xf32>
    %5 = arith.addf %2, %4 : vector<8x256xf32>
    %cst_5 = arith.constant 0.000000e+00 : f32
    %6 = vector.broadcast %cst_5 : f32 to vector<8x256xf32>
    %7 = arith.maximumf %5, %6 : vector<8x256xf32>
    %8 = arith.truncf %7 : vector<8x256xf32> to vector<8x256xbf16>
    %c0_6 = arith.constant 0 : index
    %c0_7 = arith.constant 0 : index
    %9 = vector.load %arg4[%c0_6, %c0_7] : memref<256x896xbf16, #tpu.memory_space<vmem>>, vector<256x896xbf16>
    %cst_8 = arith.constant dense<0.000000e+00> : vector<8x896xf32>
    %10 = tpu.matmul %8, %9, %cst_8 {dimension_numbers = #tpu.dot_dimension_numbers<[1], [0], [0], [1], [0, 0, 1, 1], [], []>} : vector<8x256xbf16>, vector<256x896xbf16>, vector<8x896xf32> -> vector<8x896xf32>
    %c0_9 = arith.constant 0 : index
    %c0_10 = arith.constant 0 : index
    %11 = vector.load %arg5[%c0_9, %c0_10] : memref<1x896xf32, #tpu.memory_space<vmem>>, vector<1x896xf32>
    %12 = vector.broadcast %11 : vector<1x896xf32> to vector<8x896xf32>
    %13 = arith.addf %10, %12 : vector<8x896xf32>
    %14 = arith.negf %13 : vector<8x896xf32>
    %15 = math.exp %14 : vector<8x896xf32>
    %cst_11 = arith.constant 1.000000e+00 : f32
    %16 = vector.broadcast %cst_11 : f32 to vector<8x896xf32>
    %17 = arith.addf %16, %15 : vector<8x896xf32>
    %18 = arith.divf %16, %17 : vector<8x896xf32>
    %c0_12 = arith.constant 0 : index
    %c0_13 = arith.constant 0 : index
    %19 = vector.load %arg6[%c0_12, %c0_13] : memref<8x896xf32, #tpu.memory_space<vmem>>, vector<8x896xf32>
    tpu.vector_store %arg6[%c0_12, %c0_13], %18 {strides = array<i32>} : memref<8x896xf32, #tpu.memory_space<vmem>>, vector<8x896xf32>,
    return
  }
  func.func @transform_0(%arg0: i32) -> (i32, i32) {
    %c0_i32 = arith.constant 0 : i32
    %c0_i32_0 = arith.constant 0 : i32
    return %arg0, %c0_i32 : i32, i32
  }
  func.func @transform_1(%arg0: i32) -> (i32, i32) {
    %c0_i32 = arith.constant 0 : i32
    %c0_i32_0 = arith.constant 0 : i32
    %c0_i32_1 = arith.constant 0 : i32
    return %c0_i32, %c0_i32_0 : i32, i32
  }
  func.func @transform_2(%arg0: i32) -> (i32, i32) {
    %c0_i32 = arith.constant 0 : i32
    %c0_i32_0 = arith.constant 0 : i32
    %c0_i32_1 = arith.constant 0 : i32
    return %c0_i32, %c0_i32_0 : i32, i32
  }
  func.func @transform_3(%arg0: i32) -> (i32, i32) {
    %c0_i32 = arith.constant 0 : i32
    %c0_i32_0 = arith.constant 0 : i32
    %c0_i32_1 = arith.constant 0 : i32
    return %c0_i32, %c0_i32_0 : i32, i32
  }
  func.func @transform_4(%arg0: i32) -> (i32, i32) {
    %c0_i32 = arith.constant 0 : i32
    %c0_i32_0 = arith.constant 0 : i32
    %c0_i32_1 = arith.constant 0 : i32
    return %c0_i32, %c0_i32_0 : i32, i32
  }
  func.func @transform_5(%arg0: i32) -> (i32, i32) {
    %c0_i32 = arith.constant 0 : i32
    %c0_i32_0 = arith.constant 0 : i32
    return %arg0, %c0_i32 : i32, i32
  }
}

</mosaic_0001>

<bundles_post_ra>
// kernel: tpu_custom_call.1
= control target key start
LH: loop header
LB: loop body
LE: loop exit
PB: predicated region body
PF: predicated region fallthrough
CT: control target
= control target key end

     0   :  { %10 = vsyncpa [#allocation3], 0  ;;  %s2086_s0 = inlined_call_operand.hbm [shape: bf16[8,32], index: 0, kind: input, shape index: {}]   ;;  %s2087_s1 = inlined_call_operand.hbm [shape: bf16[32,256], index: 1, kind: input, shape index: {}]   ;;  %s2088_s2 = inlined_call_operand.hbm [shape: f32[1,256], index: 2, kind: input, shape index: {}]   ;;  %s2089_s3 = inlined_call_operand.hbm [shape: bf16[256,896], index: 3, kind: input, shape index: {}]   ;;  %s2090_s4 = inlined_call_operand.hbm [shape: f32[1,896], index: 4, kind: input, shape index: {}]   ;;  %s2091_s5 = inlined_call_operand.hbm [shape: f32[8,896], index: 5, kind: output, shape index: {}]  }
   0x1   :  { %11 = vsyncpa [#allocation6], 0 }
   0x2   :  { %12 = vsyncpa [#allocation9], 0  ;;  %s29_s20 = sshll.u32 %s2087_s1, 4  ;;  %s30_s20 = int_to_ptr.hbm [resolvable:$true] %s29_s20 }
   0x3   :  { %13 = vsyncpa [#allocation4], 0  ;;  %s1999_s21 = smov [#allocation5]   ;;  %s53_s25 = sshll.u32 %s2089_s3, 4  ;;  %s54_s25 = int_to_ptr.hbm [resolvable:$true] %s53_s25 }
   0x4   :  { %s31_s22 = sshll.u32 %s1999_s21, 4  ;;  %s2000_s26 = smov 128   ;;  %s32_s22 = int_to_ptr.vmem [resolvable:$true] %s31_s22 }
   0x5   :  { %s2001_s27 = smov 8   ;;  %s2002_s28 = smov [#allocation8]  }
   0x6   :  { %37 = dma.hbm_to_vmem [thread:$0]  %s30_s20, 512, %s32_s22, [#allocation6], %s2000_s26, %s2000_s26, %s2001_s27  }
   0x7   :  { %s55_s29 = sshll.u32 %s2002_s28, 4  ;;  %s2003_s30 = smov 448   ;;  %s56_s29 = int_to_ptr.vmem [resolvable:$true] %s55_s29 }
   0x8   :  { %s2004_s6 = smov 28   ;;  %s19_s8 = sshll.u32 %s2086_s0, 4  ;;  %s20_s8 = int_to_ptr.hbm [resolvable:$true] %s19_s8 }
   0x9   :  { %61 = dma.hbm_to_vmem [thread:$0]  %s54_s25, 14336, %s56_s29, [#allocation9], %s2003_s30, %s2003_s30, %s2004_s6  }
   0xa   :  { %s2005_s9 = smov [#allocation2]   ;;  %s43_s12 = sshll.u32 %s2088_s2, 4  ;;  %s44_s12 = int_to_ptr.hbm [resolvable:$true] %s43_s12 }
   0xb   :  { %s21_s10 = sshll.u32 %s2005_s9, 4  ;;  %s2006_s13 = smov [#allocation7]   ;;  %s22_s10 = int_to_ptr.vmem [resolvable:$true] %s21_s10 }
   0xc   :  { %24 = dma.hbm_to_vmem [thread:$0]  %s20_s8, 64, %s22_s10, [#allocation3]  }
   0xd   :  { %s45_s14 = sshll.u32 %s2006_s13, 4  ;;  %s67_s17 = sshll.u32 %s2090_s4, 4  ;;  %s46_s14 = int_to_ptr.vmem [resolvable:$true] %s45_s14  ;;  %s68_s17 = int_to_ptr.hbm [resolvable:$true] %s67_s17 }
   0xe   :  { %48 = dma.hbm_to_vmem [thread:$0]  %s44_s12, 32, %s46_s14, [#allocation6]  }
   0xf   :  { %s2007_s0 = smov [#allocation10]  }
  0x10   :  { %s69_s18 = sshll.u32 %s2007_s0, 4  ;;  %s70_s18 = int_to_ptr.vmem [resolvable:$true] %s69_s18 }
  0x11   :  { %72 = dma.hbm_to_vmem [thread:$0]  %s68_s17, 112, %s70_s18, [#allocation9]  }
  0x12   :  { %1991 = dma.done.wait [#allocation3], 64  }
  0x13   :  { %1992 = vsyncadd [#allocation3], 4294967232 }
  0x14   :  { %1993 = dma.done.wait [#allocation6], 544  }
  0x15   :  { %1994 = vsyncadd [#allocation6], 4294966752 }
  0x16   :  { %1995 = dma.done.wait [#allocation9], 14448  }
  0x17   :  { %1996 = vsyncadd [#allocation9], 4294952848  ;;  %v1230_v0 = vld [vmem:[#allocation5 + $0x10] sm:$0xf]  ;;  %v1696_v1 = vld [vmem:[#allocation5 + $0x14] sm:$0xf0] }
  0x18   :  { %v1695_v2 = vld [vmem:[#allocation5 + $0x14] sm:$0xf]  ;;  %v1231_v3 = vor.u32 %v1696_v1, %v1230_v0  ;;  %v1232_v4 = vld [vmem:[#allocation5 + $0x18] sm:$0xf0]  ;;  %v1222_v5 = vld [vmem:[#allocation5] sm:$0xf] }
  0x19   :  { %v1694_v6 = vld [vmem:[#allocation5 + $0x4] sm:$0xf0]  ;;  %v1235_v7 = vor.u32 %v1695_v2, %v1232_v4  ;;  %v1693_v8 = vld [vmem:[#allocation5 + $0x4] sm:$0xf]  ;;  %v1224_v9 = vld [vmem:[#allocation5 + $0x8] sm:$0xf0] }
  0x1a   :  { %vm125_vm0 = vcmask 261120   ;;  %135 = vmatpush.bf16.msra.mxu0 %v1231_v3  ;;  %v1223_v10 = vor.u32 %v1694_v6, %v1222_v5  ;;  %v1436_v11 = vld [vmem:[#allocation8 + $0x188] sm:$0xf]  ;;  %v1749_v12 = vld [vmem:[#allocation8 + $0x1a0] sm:$0xf0]  ;;  %v1227_v14 = vor.u32 %v1693_v8, %v1224_v9  ;;  %s2008_s2 = smov [#allocation11]  }
  0x1b   :  { %v1660_v13 = vld [vmem:[#allocation8 + $0x348] sm:$0xf]  ;;  %148 = vmatpush.bf16.msra.mxu1 %v1235_v7  ;;  %v1437_v15 = vor.u32 %v1749_v12, %v1436_v11  ;;  %v1805_v16 = vld [vmem:[#allocation8 + $0x360] sm:$0xf0]  ;;  %v1746_v17 = vld [vmem:[#allocation8 + $0x18c] sm:$0xf] }
  0x1c   :  { %v1438_v18 = vld [vmem:[#allocation8 + $0x1a4] sm:$0xf0]  ;;  %v94_v19 = vld [vmem:[#allocation2] sm:$0xf]  ;;  %v1661_v20 = vor.u32 %v1805_v16, %v1660_v13  ;;  %v1802_v22 = vld [vmem:[#allocation8 + $0x34c] sm:$0xf] }
  0x1d   :  { %v1441_v21 = vor.u32 %v1746_v17, %v1438_v18  ;;  %v1662_v23 = vld [vmem:[#allocation8 + $0x364] sm:$0xf0]  ;;  %v1408_v24 = vld [vmem:[#allocation8 + $0x150] sm:$0xf]  ;;  %879 = vmatpush.bf16.msra.mxu2 %v1437_v15  ;;  %v1742_v26 = vld [vmem:[#allocation8 + $0x168] sm:$0xf0] }
  0x1e   :  { %v1665_v25 = vor.u32 %v1802_v22, %v1662_v23  ;;  %v1632_v27 = vld [vmem:[#allocation8 + $0x310] sm:$0xf]  ;;  %v1798_v28 = vld [vmem:[#allocation8 + $0x328] sm:$0xf0]  ;;  %136 = vmatpush.bf16.msra.mxu0 %v1223_v10  ;;  %892 = vmatpush.bf16.msra.mxu3 %v1661_v20  ;;  %v1409_v29 = vor.u32 %v1742_v26, %v1408_v24  ;;  %v1739_v31 = vld [vmem:[#allocation8 + $0x154] sm:$0xf] }
  0x1f   :  { %v1633_v30 = vor.u32 %v1798_v28, %v1632_v27  ;;  %v1410_v32 = vld [vmem:[#allocation8 + $0x16c] sm:$0xf0]  ;;  %v1795_v33 = vld [vmem:[#allocation8 + $0x314] sm:$0xf]  ;;  %149 = vmatpush.bf16.msra.mxu1 %v1227_v14  ;;  %v1380_v36 = vld [vmem:[#allocation8 + $0x118] sm:$0xf] }
  0x20   :  { %v1413_v34 = vor.u32 %v1739_v31, %v1410_v32  ;;  %v1634_v35 = vld [vmem:[#allocation8 + $0x32c] sm:$0xf0]  ;;  %v1735_v37 = vld [vmem:[#allocation8 + $0x130] sm:$0xf0]  ;;  %v1604_v39 = vld [vmem:[#allocation8 + $0x2d8] sm:$0xf] }
  0x21   :  { %v1637_v38 = vor.u32 %v1795_v33, %v1634_v35  ;;  %v1791_v40 = vld [vmem:[#allocation8 + $0x2f0] sm:$0xf0]  ;;  %v1732_v41 = vld [vmem:[#allocation8 + $0x11c] sm:$0xf]  ;;  %1236 = vmatmul.msk.bf16.vlgmr.msra.gmra.mxu0 %vm125_vm0, %v94_v19  ;;  %880 = vmatpush.bf16.msra.mxu2 %v1409_v29  ;;  %v1381_v42 = vor.u32 %v1735_v37, %v1380_v36  ;;  %v1382_v43 = vld [vmem:[#allocation8 + $0x134] sm:$0xf0] }
  0x22   :  { %905 = vmatpush.bf16.msrb.mxu0 %v1441_v21  ;;  %v1788_v44 = vld [vmem:[#allocation8 + $0x2dc] sm:$0xf]  ;;  %v1606_v45 = vld [vmem:[#allocation8 + $0x2f4] sm:$0xf0]  ;;  %1237 = vmatmul.msk.bf16.vlgmr.msra.gmra.mxu1 %vm125_vm0, %v94_v19  ;;  %v1605_v46 = vor.u32 %v1791_v40, %v1604_v39  ;;  %v1352_v47 = vld [vmem:[#allocation8 + $0xe0] sm:$0xf]  ;;  %v1385_v49 = vor.u32 %v1732_v41, %v1382_v43 }
  0x23   :  { %918 = vmatpush.bf16.msrb.mxu1 %v1665_v25  ;;  %893 = vmatpush.bf16.msra.mxu3 %v1633_v30  ;;  %v1728_v48 = vld [vmem:[#allocation8 + $0xf8] sm:$0xf0]  ;;  %v1576_v50 = vld [vmem:[#allocation8 + $0x2a0] sm:$0xf]  ;;  %v1609_v52 = vor.u32 %v1788_v44, %v1606_v45  ;;  %v1725_v53 = vld [vmem:[#allocation8 + $0xe4] sm:$0xf] }
  0x24   :  { %v1784_v51 = vld [vmem:[#allocation8 + $0x2b8] sm:$0xf0]  ;;  %v1354_v54 = vld [vmem:[#allocation8 + $0xfc] sm:$0xf0]  ;;  %v1353_v55 = vor.u32 %v1728_v48, %v1352_v47  ;;  %v1781_v56 = vld [vmem:[#allocation8 + $0x2a4] sm:$0xf] }
  0x25   :  { %881 = vmatpush.bf16.msra.mxu2 %v1381_v42  ;;  %v1578_v57 = vld [vmem:[#allocation8 + $0x2bc] sm:$0xf0]  ;;  %v1577_v58 = vor.u32 %v1784_v51, %v1576_v50  ;;  %v1324_v59 = vld [vmem:[#allocation8 + $0xa8] sm:$0xf]  ;;  %v1721_v60 = vld [vmem:[#allocation8 + $0xc0] sm:$0xf0]  ;;  %v1357_v61 = vor.u32 %v1725_v53, %v1354_v54 }
  0x26   :  { %906 = vmatpush.bf16.msrb.mxu0 %v1413_v34  ;;  %v1548_v62 = vld [vmem:[#allocation8 + $0x268] sm:$0xf]  ;;  %v1777_v63 = vld [vmem:[#allocation8 + $0x280] sm:$0xf0]  ;;  %v1581_v0 = vor.u32 %v1781_v56, %v1578_v57  ;;  %v1718_v1 = vld [vmem:[#allocation8 + $0xac] sm:$0xf]  ;;  %v1325_v3 = vor.u32 %v1721_v60, %v1324_v59 }
  0x27   :  { %919 = vmatpush.bf16.msrb.mxu1 %v1637_v38  ;;  %894 = vmatpush.bf16.msra.mxu3 %v1605_v46  ;;  %v1326_v2 = vld [vmem:[#allocation8 + $0xc4] sm:$0xf0]  ;;  %v1774_v4 = vld [vmem:[#allocation8 + $0x26c] sm:$0xf]  ;;  %v1549_v6 = vor.u32 %v1777_v63, %v1548_v62  ;;  %v1296_v7 = vld [vmem:[#allocation8 + $0x70] sm:$0xf] }
  0x28   :  { %v1550_v5 = vld [vmem:[#allocation8 + $0x284] sm:$0xf0]  ;;  %v1714_v8 = vld [vmem:[#allocation8 + $0x88] sm:$0xf0]  ;;  %v1329_v9 = vor.u32 %v1718_v1, %v1326_v2  ;;  %v1520_v10 = vld [vmem:[#allocation8 + $0x230] sm:$0xf] }
  0x29   :  { %882 = vmatpush.bf16.msra.mxu2 %v1353_v55  ;;  %v1770_v11 = vld [vmem:[#allocation8 + $0x248] sm:$0xf0]  ;;  %v1553_v12 = vor.u32 %v1774_v4, %v1550_v5  ;;  %v1711_v13 = vld [vmem:[#allocation8 + $0x74] sm:$0xf]  ;;  %v1298_v14 = vld [vmem:[#allocation8 + $0x8c] sm:$0xf0]  ;;  %v1297_v15 = vor.u32 %v1714_v8, %v1296_v7 }
  0x2a   :  { %907 = vmatpush.bf16.msrb.mxu0 %v1385_v49  ;;  %v1767_v16 = vld [vmem:[#allocation8 + $0x234] sm:$0xf]  ;;  %v1522_v17 = vld [vmem:[#allocation8 + $0x24c] sm:$0xf0]  ;;  %v1521_v18 = vor.u32 %v1770_v11, %v1520_v10  ;;  %v1268_v19 = vld [vmem:[#allocation8 + $0x38] sm:$0xf]  ;;  %v1301_v21 = vor.u32 %v1711_v13, %v1298_v14 }
  0x2b   :  { %920 = vmatpush.bf16.msrb.mxu1 %v1609_v52  ;;  %895 = vmatpush.bf16.msra.mxu3 %v1577_v58  ;;  %v1707_v20 = vld [vmem:[#allocation8 + $0x50] sm:$0xf0]  ;;  %v1492_v22 = vld [vmem:[#allocation8 + $0x1f8] sm:$0xf]  ;;  %v1525_v24 = vor.u32 %v1767_v16, %v1522_v17  ;;  %v1704_v25 = vld [vmem:[#allocation8 + $0x3c] sm:$0xf] }
  0x2c   :  { %v1763_v23 = vld [vmem:[#allocation8 + $0x210] sm:$0xf0]  ;;  %v1270_v26 = vld [vmem:[#allocation8 + $0x54] sm:$0xf0]  ;;  %v1760_v27 = vld [vmem:[#allocation8 + $0x1fc] sm:$0xf]  ;;  %v1269_v28 = vor.u32 %v1707_v20, %v1268_v19 }
  0x2d   :  { %883 = vmatpush.bf16.msra.mxu2 %v1325_v3  ;;  %v1494_v29 = vld [vmem:[#allocation8 + $0x214] sm:$0xf0]  ;;  %v1240_v30 = vld [vmem:[#allocation8] sm:$0xf]  ;;  %v1700_v31 = vld [vmem:[#allocation8 + $0x18] sm:$0xf0]  ;;  %v1493_v32 = vor.u32 %v1763_v23, %v1492_v22  ;;  %v1273_v36 = vor.u32 %v1704_v25, %v1270_v26 }
  0x2e   :  { %908 = vmatpush.bf16.msrb.mxu0 %v1357_v61  ;;  %v1464_v33 = vld [vmem:[#allocation8 + $0x1c0] sm:$0xf]  ;;  %v1756_v34 = vld [vmem:[#allocation8 + $0x1d8] sm:$0xf0]  ;;  %v1697_v35 = vld [vmem:[#allocation8 + $0x4] sm:$0xf]  ;;  %v1497_v40 = vor.u32 %v1760_v27, %v1494_v29  ;;  %v1241_v44 = vor.u32 %v1700_v31, %v1240_v30 }
  0x2f   :  { %921 = vmatpush.bf16.msrb.mxu1 %v1581_v0  ;;  %896 = vmatpush.bf16.msra.mxu3 %v1549_v6  ;;  %v1242_v37 = vld [vmem:[#allocation8 + $0x1c] sm:$0xf0]  ;;  %v1444_v38 = vld [vmem:[#allocation8 + $0x190] sm:$0xf]  ;;  %v1750_v39 = vld [vmem:[#allocation8 + $0x1a8] sm:$0xf0]  ;;  %v1465_v48 = vor.u32 %v1756_v34, %v1464_v33 }
  0x30   :  { %v1753_v41 = vld [vmem:[#allocation8 + $0x1c4] sm:$0xf]  ;;  %v1668_v42 = vld [vmem:[#allocation8 + $0x350] sm:$0xf]  ;;  %v1806_v43 = vld [vmem:[#allocation8 + $0x368] sm:$0xf0]  ;;  %v1445_v49 = vor.u32 %v1750_v39, %v1444_v38  ;;  %v1245_v52 = vor.u32 %v1697_v35, %v1242_v37 }
  0x31   :  { %884 = vmatpush.bf16.msra.mxu2 %v1297_v15  ;;  %v1466_v45 = vld [vmem:[#allocation8 + $0x1dc] sm:$0xf0]  ;;  %v1747_v46 = vld [vmem:[#allocation8 + $0x194] sm:$0xf]  ;;  %v1446_v47 = vld [vmem:[#allocation8 + $0x1ac] sm:$0xf0]  ;;  %v1669_v53 = vor.u32 %v1806_v43, %v1668_v42 }
  0x32   :  { %909 = vmatpush.bf16.msrb.mxu0 %v1329_v9  ;;  %v1803_v50 = vld [vmem:[#allocation8 + $0x354] sm:$0xf]  ;;  %v1670_v51 = vld [vmem:[#allocation8 + $0x36c] sm:$0xf0]  ;;  %v1416_v54 = vld [vmem:[#allocation8 + $0x158] sm:$0xf]  ;;  %v1469_v56 = vor.u32 %v1753_v41, %v1466_v45  ;;  %v1449_v57 = vor.u32 %v1747_v46, %v1446_v47 }
  0x33   :  { %922 = vmatpush.bf16.msrb.mxu1 %v1553_v12  ;;  %897 = vmatpush.bf16.msra.mxu3 %v1521_v18  ;;  %v1743_v55 = vld [vmem:[#allocation8 + $0x170] sm:$0xf0]  ;;  %v1640_v58 = vld [vmem:[#allocation8 + $0x318] sm:$0xf]  ;;  %v1673_v60 = vor.u32 %v1803_v50, %v1670_v51  ;;  %v1740_v61 = vld [vmem:[#allocation8 + $0x15c] sm:$0xf] }
  0x34   :  { %v1799_v59 = vld [vmem:[#allocation8 + $0x330] sm:$0xf0]  ;;  %v1418_v62 = vld [vmem:[#allocation8 + $0x174] sm:$0xf0]  ;;  %v1417_v63 = vor.u32 %v1743_v55, %v1416_v54  ;;  %v1796_v0 = vld [vmem:[#allocation8 + $0x31c] sm:$0xf] }
  0x35   :  { %885 = vmatpush.bf16.msra.mxu2 %v1269_v28  ;;  %v1642_v1 = vld [vmem:[#allocation8 + $0x334] sm:$0xf0]  ;;  %v1641_v2 = vor.u32 %v1799_v59, %v1640_v58  ;;  %v1388_v3 = vld [vmem:[#allocation8 + $0x120] sm:$0xf]  ;;  %v1736_v4 = vld [vmem:[#allocation8 + $0x138] sm:$0xf0]  ;;  %v1421_v5 = vor.u32 %v1740_v61, %v1418_v62 }
  0x36   :  { %910 = vmatpush.bf16.msrb.mxu0 %v1301_v21  ;;  %v1612_v6 = vld [vmem:[#allocation8 + $0x2e0] sm:$0xf]  ;;  %v1792_v7 = vld [vmem:[#allocation8 + $0x2f8] sm:$0xf0]  ;;  %v1645_v8 = vor.u32 %v1796_v0, %v1642_v1  ;;  %v1733_v9 = vld [vmem:[#allocation8 + $0x124] sm:$0xf]  ;;  %v1389_v11 = vor.u32 %v1736_v4, %v1388_v3 }
  0x37   :  { %923 = vmatpush.bf16.msrb.mxu1 %v1525_v24  ;;  %898 = vmatpush.bf16.msra.mxu3 %v1493_v32  ;;  %v1390_v10 = vld [vmem:[#allocation8 + $0x13c] sm:$0xf0]  ;;  %v1789_v12 = vld [vmem:[#allocation8 + $0x2e4] sm:$0xf]  ;;  %v1613_v14 = vor.u32 %v1792_v7, %v1612_v6  ;;  %v1360_v15 = vld [vmem:[#allocation8 + $0xe8] sm:$0xf] }
  0x38   :  { %v1614_v13 = vld [vmem:[#allocation8 + $0x2fc] sm:$0xf0]  ;;  %v1729_v16 = vld [vmem:[#allocation8 + $0x100] sm:$0xf0]  ;;  %v1393_v17 = vor.u32 %v1733_v9, %v1390_v10  ;;  %v1584_v18 = vld [vmem:[#allocation8 + $0x2a8] sm:$0xf] }
  0x39   :  { %886 = vmatpush.bf16.msra.mxu2 %v1241_v44  ;;  %v1785_v19 = vld [vmem:[#allocation8 + $0x2c0] sm:$0xf0]  ;;  %v1617_v20 = vor.u32 %v1789_v12, %v1614_v13  ;;  %v1726_v21 = vld [vmem:[#allocation8 + $0xec] sm:$0xf]  ;;  %v1362_v22 = vld [vmem:[#allocation8 + $0x104] sm:$0xf0]  ;;  %v1361_v23 = vor.u32 %v1729_v16, %v1360_v15 }
  0x3a   :  { %911 = vmatpush.bf16.msrb.mxu0 %v1273_v36  ;;  %v1782_v24 = vld [vmem:[#allocation8 + $0x2ac] sm:$0xf]  ;;  %v1586_v25 = vld [vmem:[#allocation8 + $0x2c4] sm:$0xf0]  ;;  %v1585_v26 = vor.u32 %v1785_v19, %v1584_v18  ;;  %v1332_v27 = vld [vmem:[#allocation8 + $0xb0] sm:$0xf]  ;;  %v1365_v29 = vor.u32 %v1726_v21, %v1362_v22 }
  0x3b   :  { %924 = vmatpush.bf16.msrb.mxu1 %v1497_v40  ;;  %899 = vmatpush.bf16.msra.mxu3 %v1465_v48  ;;  %v1722_v28 = vld [vmem:[#allocation8 + $0xc8] sm:$0xf0]  ;;  %v1556_v30 = vld [vmem:[#allocation8 + $0x270] sm:$0xf]  ;;  %v1589_v32 = vor.u32 %v1782_v24, %v1586_v25  ;;  %v1719_v33 = vld [vmem:[#allocation8 + $0xb4] sm:$0xf] }
  0x3c   :  { %v1778_v31 = vld [vmem:[#allocation8 + $0x288] sm:$0xf0]  ;;  %v1334_v34 = vld [vmem:[#allocation8 + $0xcc] sm:$0xf0]  ;;  %v1333_v35 = vor.u32 %v1722_v28, %v1332_v27  ;;  %v1775_v36 = vld [vmem:[#allocation8 + $0x274] sm:$0xf] }
  0x3d   :  { %931 = vmatpush.bf16.msrb.mxu2 %v1445_v49  ;;  %v1558_v37 = vld [vmem:[#allocation8 + $0x28c] sm:$0xf0]  ;;  %v1557_v38 = vor.u32 %v1778_v31, %v1556_v30  ;;  %v1304_v39 = vld [vmem:[#allocation8 + $0x78] sm:$0xf]  ;;  %v1715_v40 = vld [vmem:[#allocation8 + $0x90] sm:$0xf0]  ;;  %v1337_v41 = vor.u32 %v1719_v33, %v1334_v34 }
  0x3e   :  { %912 = vmatpush.bf16.msrb.mxu0 %v1245_v52  ;;  %v1528_v42 = vld [vmem:[#allocation8 + $0x238] sm:$0xf]  ;;  %v1771_v43 = vld [vmem:[#allocation8 + $0x250] sm:$0xf0]  ;;  %v1561_v44 = vor.u32 %v1775_v36, %v1558_v37  ;;  %v1712_v45 = vld [vmem:[#allocation8 + $0x7c] sm:$0xf]  ;;  %v1305_v47 = vor.u32 %v1715_v40, %v1304_v39 }
  0x3f   :  { %944 = vmatpush.bf16.msrb.mxu3 %v1669_v53  ;;  %925 = vmatpush.bf16.msrb.mxu1 %v1469_v56  ;;  %v1306_v46 = vld [vmem:[#allocation8 + $0x94] sm:$0xf0]  ;;  %v1768_v48 = vld [vmem:[#allocation8 + $0x23c] sm:$0xf]  ;;  %v1529_v50 = vor.u32 %v1771_v43, %v1528_v42  ;;  %v1276_v53 = vld [vmem:[#allocation8 + $0x40] sm:$0xf] }
  0x40   :  { %v1530_v49 = vld [vmem:[#allocation8 + $0x254] sm:$0xf0]  ;;  %v1309_v51 = vor.u32 %v1712_v45, %v1306_v46  ;;  %v1708_v54 = vld [vmem:[#allocation8 + $0x58] sm:$0xf0]  ;;  %v1500_v56 = vld [vmem:[#allocation8 + $0x200] sm:$0xf] }
  0x41   :  { %932 = vmatpush.bf16.msrb.mxu2 %v1417_v63  ;;  %v1533_v52 = vor.u32 %v1768_v48, %v1530_v49  ;;  %v1277_v55 = vor.u32 %v1708_v54, %v1276_v53  ;;  %v1705_v58 = vld [vmem:[#allocation8 + $0x44] sm:$0xf]  ;;  %v1502_v62 = vld [vmem:[#allocation8 + $0x21c] sm:$0xf0]  ;;  %v1248_v1 = vld [vmem:[#allocation8 + $0x8] sm:$0xf] }
  0x42   :  { %957 = vmatpush.bf16.msra.mxu0 %v1449_v57  ;;  %v1764_v57 = vld [vmem:[#allocation8 + $0x218] sm:$0xf0]  ;;  %v1761_v61 = vld [vmem:[#allocation8 + $0x204] sm:$0xf]  ;;  %v1472_v3 = vld [vmem:[#allocation8 + $0x1c8] sm:$0xf] }
  0x43   :  { %970 = vmatpush.bf16.msra.mxu1 %v1673_v60  ;;  %945 = vmatpush.bf16.msrb.mxu3 %v1641_v2  ;;  %v1501_v59 = vor.u32 %v1764_v57, %v1500_v56  ;;  %v1278_v60 = vld [vmem:[#allocation8 + $0x5c] sm:$0xf0]  ;;  %v1505_v0 = vor.u32 %v1761_v61, %v1502_v62  ;;  %v1701_v2 = vld [vmem:[#allocation8 + $0x20] sm:$0xf0]  ;;  %v1698_v6 = vld [vmem:[#allocation8 + $0xc] sm:$0xf] }
  0x44   :  { %v1281_v63 = vor.u32 %v1705_v58, %v1278_v60  ;;  %v1249_v4 = vor.u32 %v1701_v2, %v1248_v1  ;;  %v1250_v7 = vld [vmem:[#allocation8 + $0x24] sm:$0xf0]  ;;  %v1754_v10 = vld [vmem:[#allocation8 + $0x1cc] sm:$0xf]  ;;  %v99_v13 = vld [vmem:[#allocation7] sm:$0x3] }
  0x45   :  { %933 = vmatpush.bf16.msrb.mxu2 %v1389_v11  ;;  %v1253_v9 = vor.u32 %v1698_v6, %v1250_v7  ;;  %v1474_v11 = vld [vmem:[#allocation8 + $0x1e4] sm:$0xf0]  ;;  %v102_v15 = vperm.slane %v99_v13, 1  ;;  %v1452_v19 = vld [vmem:[#allocation8 + $0x198] sm:$0xf]  ;;  %s1206_s4 = sshll.u32 %s2008_s2, 4  ;;  %s1207_s4 = int_to_ptr.vmem [resolvable:$true] %s1206_s4 }
  0x46   :  { %958 = vmatpush.bf16.msra.mxu0 %v1421_v5  ;;  %v1757_v5 = vld [vmem:[#allocation8 + $0x1e0] sm:$0xf0]  ;;  %v1477_v12 = vor.u32 %v1754_v10, %v1474_v11  ;;  %v1676_v21 = vld [vmem:[#allocation8 + $0x358] sm:$0xf]  ;;  %v1748_v24 = vld [vmem:[#allocation8 + $0x19c] sm:$0xf] }
  0x47   :  { %971 = vmatpush.bf16.msra.mxu1 %v1645_v8  ;;  %946 = vmatpush.bf16.msrb.mxu3 %v1613_v14  ;;  %v1473_v8 = vor.u32 %v1757_v5, %v1472_v3  ;;  %v101_v14 = vperm.slane %v99_v13, 0  ;;  %v1454_v25 = vld [vmem:[#allocation8 + $0x1b4] sm:$0xf0]  ;;  %v1804_v27 = vld [vmem:[#allocation8 + $0x35c] sm:$0xf]  ;;  %s1208_s21 = sshll.u32 %s2091_s5, 4  ;;  %s1209_s21 = int_to_ptr.hbm [resolvable:$true] %s1208_s21 }
  0x48   :  { %v1678_v28 = vld [vmem:[#allocation8 + $0x374] sm:$0xf0]  ;;  %v1424_v33 = vld [vmem:[#allocation8 + $0x160] sm:$0xf]  ;;  %v1744_v34 = vld [vmem:[#allocation8 + $0x178] sm:$0xf0]  ;;  %v1457_v36 = vor.u32 %v1748_v24, %v1454_v25 }
  0x49   :  { %934 = vmatpush.bf16.msrb.mxu2 %v1361_v23  ;;  %v1807_v23 = vld [vmem:[#allocation8 + $0x370] sm:$0xf0]  ;;  %v1681_v37 = vor.u32 %v1804_v27, %v1678_v28  ;;  %v1800_v39 = vld [vmem:[#allocation8 + $0x338] sm:$0xf0]  ;;  %v1741_v40 = vld [vmem:[#allocation8 + $0x164] sm:$0xf]  ;;  %v1425_v46 = vor.u32 %v1744_v34, %v1424_v33 }
  0x4a   :  { %959 = vmatpush.bf16.msra.mxu0 %v1393_v17  ;;  %v1797_v42 = vld [vmem:[#allocation8 + $0x324] sm:$0xf]  ;;  %v1650_v43 = vld [vmem:[#allocation8 + $0x33c] sm:$0xf0]  ;;  %v1396_v48 = vld [vmem:[#allocation8 + $0x128] sm:$0xf] }
  0x4b   :  { %972 = vmatpush.bf16.msra.mxu1 %v1617_v20  ;;  %947 = vmatpush.bf16.msrb.mxu3 %v1585_v26  ;;  %v1751_v20 = vld [vmem:[#allocation8 + $0x1b0] sm:$0xf0]  ;;  %v1737_v49 = vld [vmem:[#allocation8 + $0x140] sm:$0xf0]  ;;  %v1734_v54 = vld [vmem:[#allocation8 + $0x12c] sm:$0xf] }
  0x4c   :  { %v1453_v31 = vor.u32 %v1751_v20, %v1452_v19  ;;  %v1793_v53 = vld [vmem:[#allocation8 + $0x300] sm:$0xf0]  ;;  %v1790_v56 = vld [vmem:[#allocation8 + $0x2ec] sm:$0xf]  ;;  %v1622_v57 = vld [vmem:[#allocation8 + $0x304] sm:$0xf0]  ;;  %v1397_v58 = vor.u32 %v1737_v49, %v1396_v48 }
  0x4d   :  { %935 = vmatpush.bf16.msrb.mxu2 %v1333_v35  ;;  %v1368_v60 = vld [vmem:[#allocation8 + $0xf0] sm:$0xf]  ;;  %v1730_v61 = vld [vmem:[#allocation8 + $0x108] sm:$0xf0]  ;;  %v1727_v2 = vld [vmem:[#allocation8 + $0xf4] sm:$0xf] }
  0x4e   :  { %960 = vmatpush.bf16.msra.mxu0 %v1365_v29  ;;  %v1786_v1 = vld [vmem:[#allocation8 + $0x2c8] sm:$0xf0]  ;;  %v1370_v3 = vld [vmem:[#allocation8 + $0x10c] sm:$0xf0]  ;;  %v1369_v6 = vor.u32 %v1730_v61, %v1368_v60  ;;  %v1779_v13 = vld [vmem:[#allocation8 + $0x290] sm:$0xf0] }
  0x4f   :  { %973 = vmatpush.bf16.msra.mxu1 %v1589_v32  ;;  %948 = vmatpush.bf16.msrb.mxu3 %v1557_v38  ;;  %v1677_v32 = vor.u32 %v1807_v23, %v1676_v21  ;;  %v1648_v38 = vld [vmem:[#allocation8 + $0x320] sm:$0xf]  ;;  %v1594_v5 = vld [vmem:[#allocation8 + $0x2cc] sm:$0xf0]  ;;  %v1373_v10 = vor.u32 %v1727_v2, %v1370_v3  ;;  %v1716_v21 = vld [vmem:[#allocation8 + $0x98] sm:$0xf0] }
  0x50   :  { %v1312_v20 = vld [vmem:[#allocation8 + $0x80] sm:$0xf]  ;;  %v1772_v25 = vld [vmem:[#allocation8 + $0x258] sm:$0xf0]  ;;  %v1769_v28 = vld [vmem:[#allocation8 + $0x244] sm:$0xf] }
  0x51   :  { %936 = vmatpush.bf16.msrb.mxu2 %v1305_v47  ;;  %v1649_v47 = vor.u32 %v1800_v39, %v1648_v38  ;;  %v1536_v24 = vld [vmem:[#allocation8 + $0x240] sm:$0xf]  ;;  %v1284_v33 = vld [vmem:[#allocation8 + $0x48] sm:$0xf]  ;;  %v1709_v34 = vld [vmem:[#allocation8 + $0x60] sm:$0xf0] }
  0x52   :  { %961 = vmatpush.bf16.msra.mxu0 %v1337_v41  ;;  %v1426_v41 = vld [vmem:[#allocation8 + $0x17c] sm:$0xf0]  ;;  %v1508_v38 = vld [vmem:[#allocation8 + $0x208] sm:$0xf]  ;;  %v1765_v39 = vld [vmem:[#allocation8 + $0x220] sm:$0xf0] }
  0x53   :  { %974 = vmatpush.bf16.msra.mxu1 %v1561_v44  ;;  %949 = vmatpush.bf16.msrb.mxu3 %v1529_v50  ;;  %v1429_v50 = vor.u32 %v1741_v40, %v1426_v41  ;;  %v1314_v27 = vld [vmem:[#allocation8 + $0x9c] sm:$0xf0]  ;;  %v1706_v40 = vld [vmem:[#allocation8 + $0x4c] sm:$0xf]  ;;  %v1286_v41 = vld [vmem:[#allocation8 + $0x64] sm:$0xf0] }
  0x54   :  { %v1480_v48 = vld [vmem:[#allocation8 + $0x1d0] sm:$0xf]  ;;  %v1289_v49 = vor.u32 %v1706_v40, %v1286_v41  ;;  %v1432_v2 = vld [vmem:[#allocation8 + $0x168] sm:$0xf]  ;;  %v1745_v3 = vld [vmem:[#allocation8 + $0x180] sm:$0xf0] }
  0x55   :  { %937 = vmatpush.bf16.msrb.mxu2 %v1277_v55  ;;  %v1398_v55 = vld [vmem:[#allocation8 + $0x144] sm:$0xf0]  ;;  %v1264_v40 = vld [vmem:[#allocation8 + $0x18] sm:$0xf]  ;;  %v1703_v41 = vld [vmem:[#allocation8 + $0x30] sm:$0xf0] }
  0x56   :  { %962 = vmatpush.bf16.msra.mxu0 %v1309_v51  ;;  %v1653_v51 = vor.u32 %v1797_v42, %v1650_v43  ;;  %v1401_v62 = vor.u32 %v1734_v54, %v1398_v55  ;;  %v1762_v42 = vld [vmem:[#allocation8 + $0x20c] sm:$0xf]  ;;  %v1510_v43 = vld [vmem:[#allocation8 + $0x224] sm:$0xf0]  ;;  %v1755_v54 = vld [vmem:[#allocation8 + $0x1d4] sm:$0xf] }
  0x57   :  { %975 = vmatpush.bf16.msra.mxu1 %v1533_v52  ;;  %950 = vmatpush.bf16.msrb.mxu3 %v1501_v59  ;;  %v1620_v52 = vld [vmem:[#allocation8 + $0x2e8] sm:$0xf]  ;;  %v1482_v55 = vld [vmem:[#allocation8 + $0x1ec] sm:$0xf0] }
  0x58   :  { %v1621_v59 = vor.u32 %v1793_v53, %v1620_v52  ;;  %v1699_v52 = vld [vmem:[#allocation8 + $0x14] sm:$0xf]  ;;  %v1258_v53 = vld [vmem:[#allocation8 + $0x2c] sm:$0xf0] }
  0x59   :  { %938 = vmatpush.bf16.msrb.mxu2 %v1249_v4  ;;  %v1783_v4 = vld [vmem:[#allocation8 + $0x2b4] sm:$0xf] }
  0x5a   :  { %963 = vmatpush.bf16.msra.mxu0 %v1281_v63  ;;  %v1625_v63 = vor.u32 %v1790_v56, %v1622_v57  ;;  %v1597_v11 = vor.u32 %v1783_v4, %v1594_v5  ;;  %v1460_v56 = vld [vmem:[#allocation8 + $0x1a0] sm:$0xf]  ;;  %v1752_v57 = vld [vmem:[#allocation8 + $0x1b8] sm:$0xf0]  ;;  %v1656_v4 = vld [vmem:[#allocation8 + $0x328] sm:$0xf] }
  0x5b   :  { %976 = vmatpush.bf16.msra.mxu1 %v1505_v0  ;;  %951 = vmatpush.bf16.msrb.mxu3 %v1473_v8  ;;  %v1592_v0 = vld [vmem:[#allocation8 + $0x2b0] sm:$0xf]  ;;  %v1340_v8 = vld [vmem:[#allocation8 + $0xb8] sm:$0xf]  ;;  %v1801_v5 = vld [vmem:[#allocation8 + $0x340] sm:$0xf0] }
  0x5c   :  { %v1593_v7 = vor.u32 %v1786_v1, %v1592_v0  ;;  %v1461_v0 = vor.u32 %v1752_v57, %v1460_v56 }
  0x5e   :  { %964 = vmatpush.bf16.msra.mxu0 %v1253_v9  ;;  %v1723_v9 = vld [vmem:[#allocation8 + $0xd0] sm:$0xf0] }
  0x5f   :  { %977 = vmatpush.bf16.msra.mxu1 %v1477_v12  ;;  %v1564_v12 = vld [vmem:[#allocation8 + $0x278] sm:$0xf] }
  0x60   :  { %v1565_v19 = vor.u32 %v1779_v13, %v1564_v12 }
  0x9e   :  { %v138_v16 = vpop.f32.mrf.mxu0 }
  0x9f   :  { %v139_v17 = vadd.f32 %v138_v16, %v101_v14  ;;  %v151_v18 = vpop.f32.mrf.mxu1  ;;  %v1720_v14 = vld [vmem:[#allocation8 + $0xbc] sm:$0xf] }
  0xa0   :  { %v152_v22 = vadd.f32 %v151_v18, %v102_v15  ;;  %v1342_v15 = vld [vmem:[#allocation8 + $0xd4] sm:$0xf0]  ;;  %v1776_v16 = vld [vmem:[#allocation8 + $0x27c] sm:$0xf]  ;;  %v1341_v18 = vor.u32 %v1723_v9, %v1340_v8  ;;  %v1404_v8 = vld [vmem:[#allocation8 + $0x130] sm:$0xf] }
  0xa1   :  { %v155_v26 = vmax.f32 %v139_v17, 0.0  ;;  %v1566_v17 = vld [vmem:[#allocation8 + $0x294] sm:$0xf0]  ;;  %v1738_v9 = vld [vmem:[#allocation8 + $0x148] sm:$0xf0] }
  0xa2   :  { %v156_v29 = vmax.f32 %v152_v22, 0.0  ;;  %v1345_v22 = vor.u32 %v1720_v14, %v1342_v15  ;;  %v1569_v23 = vor.u32 %v1776_v16, %v1566_v17  ;;  %v1405_v12 = vor.u32 %v1738_v9, %v1404_v8  ;;  %v1376_v14 = vld [vmem:[#allocation8 + $0xf8] sm:$0xf]  ;;  %v1731_v15 = vld [vmem:[#allocation8 + $0x110] sm:$0xf0] }
  0xa3   :  { %v2056_v30 = vpack.c.bf16 %v155_v26, %v155_v26  ;;  %v1713_v26 = vld [vmem:[#allocation8 + $0x84] sm:$0xf]  ;;  %v1600_v16 = vld [vmem:[#allocation8 + $0x2b8] sm:$0xf]  ;;  %v1787_v17 = vld [vmem:[#allocation8 + $0x2d0] sm:$0xf0] }
  0xa4   :  { %v2058_v35 = vpack.c.bf16 %v156_v29, %v156_v29  ;;  %v1538_v29 = vld [vmem:[#allocation8 + $0x25c] sm:$0xf0] }
  0xa5   :  { %887 = vmatmul.bf16.vlgmr.msra.gmra.mxu2 %v2056_v30  ;;  %913 = vmatmul.bf16.vlgmr.msrb.gmra.mxu0 %v2056_v30 }
  0xa6   :  { %900 = vmatmul.bf16.vlgmr.msra.gmra.mxu3 %v2058_v35  ;;  %926 = vmatmul.bf16.vlgmr.msrb.gmra.mxu1 %v2058_v35  ;;  %v140_v44 = vpop.f32.mrf.mxu0 }
  0xa7   :  { %983 = vmatpush.bf16.msra.mxu2 %v1453_v31  ;;  %996 = vmatpush.bf16.msra.mxu3 %v1677_v32  ;;  %v153_v45 = vpop.f32.mrf.mxu1  ;;  %v1313_v31 = vor.u32 %v1716_v21, %v1312_v20  ;;  %v1537_v32 = vor.u32 %v1772_v25, %v1536_v24  ;;  %v1285_v44 = vor.u32 %v1709_v34, %v1284_v33  ;;  %v1348_v20 = vld [vmem:[#allocation8 + $0xc0] sm:$0xf]  ;;  %v1724_v21 = vld [vmem:[#allocation8 + $0xd8] sm:$0xf0]  ;;  %v1292_v33 = vld [vmem:[#allocation8 + $0x50] sm:$0xf] }
  0xa8   :  { %1009 = vmatpush.bf16.msrb.mxu0 %v1457_v36  ;;  %1022 = vmatpush.bf16.msrb.mxu1 %v1681_v37  ;;  %v1317_v36 = vor.u32 %v1713_v26, %v1314_v27  ;;  %v1541_v37 = vor.u32 %v1769_v28, %v1538_v29  ;;  %v1509_v45 = vor.u32 %v1765_v39, %v1508_v38  ;;  %v1320_v26 = vld [vmem:[#allocation8 + $0x88] sm:$0xf]  ;;  %v1717_v27 = vld [vmem:[#allocation8 + $0xa0] sm:$0xf0]  ;;  %v1710_v34 = vld [vmem:[#allocation8 + $0x68] sm:$0xf0] }
  0xa9   :  { %v1349_v24 = vor.u32 %v1724_v21, %v1348_v20  ;;  %v1544_v28 = vld [vmem:[#allocation8 + $0x248] sm:$0xf]  ;;  %v1773_v29 = vld [vmem:[#allocation8 + $0x260] sm:$0xf0]  ;;  %v1293_v38 = vor.u32 %v1710_v34, %v1292_v33 }
  0xab   :  { %984 = vmatpush.bf16.msra.mxu2 %v1425_v46  ;;  %997 = vmatpush.bf16.msra.mxu3 %v1649_v47  ;;  %v1256_v46 = vld [vmem:[#allocation8 + $0x10] sm:$0xf]  ;;  %v1702_v47 = vld [vmem:[#allocation8 + $0x28] sm:$0xf0] }
  0xac   :  { %1010 = vmatpush.bf16.msrb.mxu0 %v1429_v50  ;;  %1023 = vmatpush.bf16.msrb.mxu1 %v1653_v51  ;;  %v1513_v50 = vor.u32 %v1762_v42, %v1510_v43  ;;  %v1758_v51 = vld [vmem:[#allocation8 + $0x1e8] sm:$0xf0]  ;;  %v1257_v60 = vor.u32 %v1702_v47, %v1256_v46  ;;  %v1488_v42 = vld [vmem:[#allocation8 + $0x1d8] sm:$0xf]  ;;  %v1759_v43 = vld [vmem:[#allocation8 + $0x1f0] sm:$0xf0] }
  0xad   :  { %v1481_v61 = vor.u32 %v1758_v51, %v1480_v48  ;;  %v2074_v46 = vld [vmem:[#allocation10] sm:$0xff] }
  0xae   :  { %v290_v47 = vperm.slane %v2074_v46, 1 }
  0xaf   :  { %985 = vmatpush.bf16.msra.mxu2 %v1397_v58  ;;  %998 = vmatpush.bf16.msra.mxu3 %v1621_v59  ;;  %v1684_v58 = vld [vmem:[#allocation8 + $0x360] sm:$0xf]  ;;  %v1808_v59 = vld [vmem:[#allocation8 + $0x378] sm:$0xf0] }
  0xb0   :  { %1011 = vmatpush.bf16.msrb.mxu0 %v1401_v62  ;;  %1024 = vmatpush.bf16.msrb.mxu1 %v1625_v63  ;;  %v1261_v62 = vor.u32 %v1699_v52, %v1258_v53  ;;  %v1485_v63 = vor.u32 %v1755_v54, %v1482_v55  ;;  %v1685_v1 = vor.u32 %v1808_v59, %v1684_v58  ;;  %v289_v52 = vperm.slane %v2074_v46, 0 }
  0xb3   :  { %986 = vmatpush.bf16.msra.mxu2 %v1369_v6  ;;  %999 = vmatpush.bf16.msra.mxu3 %v1593_v7  ;;  %v1433_v6 = vor.u32 %v1745_v3, %v1432_v2  ;;  %v1657_v7 = vor.u32 %v1801_v5, %v1656_v4  ;;  %v291_v5 = vperm.slane %v2074_v46, 2 }
  0xb4   :  { %1012 = vmatpush.bf16.msrb.mxu0 %v1373_v10  ;;  %1025 = vmatpush.bf16.msrb.mxu1 %v1597_v11  ;;  %v1628_v10 = vld [vmem:[#allocation8 + $0x2f0] sm:$0xf]  ;;  %v1794_v11 = vld [vmem:[#allocation8 + $0x308] sm:$0xf0] }
  0xb5   :  { %939 = vmatmul.bf16.vlgmr.msrb.gmra.mxu2 %v2056_v30  ;;  %965 = vmatmul.bf16.vlgmr.msra.gmra.mxu0 %v2056_v30  ;;  %v1629_v13 = vor.u32 %v1794_v11, %v1628_v10 }
  0xb6   :  { %952 = vmatmul.bf16.vlgmr.msrb.gmra.mxu3 %v2058_v35  ;;  %978 = vmatmul.bf16.vlgmr.msra.gmra.mxu1 %v2058_v35 }
  0xb7   :  { %987 = vmatpush.bf16.msra.mxu2 %v1341_v18  ;;  %1000 = vmatpush.bf16.msra.mxu3 %v1565_v19  ;;  %v1377_v18 = vor.u32 %v1731_v15, %v1376_v14  ;;  %v1601_v19 = vor.u32 %v1787_v17, %v1600_v16 }
  0xb8   :  { %1013 = vmatpush.bf16.msrb.mxu0 %v1345_v22  ;;  %1026 = vmatpush.bf16.msrb.mxu1 %v1569_v23  ;;  %v1572_v22 = vld [vmem:[#allocation8 + $0x280] sm:$0xf]  ;;  %v1780_v23 = vld [vmem:[#allocation8 + $0x298] sm:$0xf0] }
  0xb9   :  { %v1573_v25 = vor.u32 %v1780_v23, %v1572_v22 }
  0xbb   :  { %988 = vmatpush.bf16.msra.mxu2 %v1313_v31  ;;  %1001 = vmatpush.bf16.msra.mxu3 %v1537_v32  ;;  %v1321_v31 = vor.u32 %v1717_v27, %v1320_v26  ;;  %v1545_v32 = vor.u32 %v1773_v29, %v1544_v28 }
  0xbc   :  { %1014 = vmatpush.bf16.msrb.mxu0 %v1317_v36  ;;  %1027 = vmatpush.bf16.msrb.mxu1 %v1541_v37  ;;  %v1516_v36 = vld [vmem:[#allocation8 + $0x210] sm:$0xf]  ;;  %v1766_v37 = vld [vmem:[#allocation8 + $0x228] sm:$0xf0] }
  0xbd   :  { %v1517_v39 = vor.u32 %v1766_v37, %v1516_v36 }
  0xbf   :  { %989 = vmatpush.bf16.msra.mxu2 %v1285_v44  ;;  %1002 = vmatpush.bf16.msra.mxu3 %v1509_v45  ;;  %v1265_v44 = vor.u32 %v1703_v41, %v1264_v40  ;;  %v1489_v45 = vor.u32 %v1759_v43, %v1488_v42 }
  0xc0   :  { %1015 = vmatpush.bf16.msrb.mxu0 %v1289_v49  ;;  %1028 = vmatpush.bf16.msrb.mxu1 %v1513_v50 }
  0xc3   :  { %990 = vmatpush.bf16.msra.mxu2 %v1257_v60  ;;  %1003 = vmatpush.bf16.msra.mxu3 %v1481_v61  ;;  %v292_v60 = vperm.slane %v2074_v46, 3 }
  0xc4   :  { %1016 = vmatpush.bf16.msrb.mxu0 %v1261_v62  ;;  %1029 = vmatpush.bf16.msrb.mxu1 %v1485_v63 }
  0xc6   :  { %991 = vmatmul.bf16.vlgmr.msra.gmra.mxu2 %v2056_v30  ;;  %1004 = vmatmul.bf16.vlgmr.msra.gmra.mxu3 %v2058_v35 }
  0xc7   :  { %1035 = vmatpush.bf16.msrb.mxu2 %v1461_v0  ;;  %1048 = vmatpush.bf16.msrb.mxu3 %v1685_v1 }
  0xc8   :  { %1017 = vmatmul.bf16.vlgmr.msrb.gmra.mxu0 %v2056_v30  ;;  %1030 = vmatmul.bf16.vlgmr.msrb.gmra.mxu1 %v2058_v35 }
  0xcb   :  { %1036 = vmatpush.bf16.msrb.mxu2 %v1433_v6  ;;  %1049 = vmatpush.bf16.msrb.mxu3 %v1657_v7 }
  0xcf   :  { %1037 = vmatpush.bf16.msrb.mxu2 %v1405_v12  ;;  %1050 = vmatpush.bf16.msrb.mxu3 %v1629_v13 }
  0xd3   :  { %1038 = vmatpush.bf16.msrb.mxu2 %v1377_v18  ;;  %1051 = vmatpush.bf16.msrb.mxu3 %v1601_v19 }
  0xd7   :  { %1039 = vmatpush.bf16.msrb.mxu2 %v1349_v24  ;;  %1052 = vmatpush.bf16.msrb.mxu3 %v1573_v25 }
  0xdb   :  { %1040 = vmatpush.bf16.msrb.mxu2 %v1321_v31  ;;  %1053 = vmatpush.bf16.msrb.mxu3 %v1545_v32  ;;  %v294_v32 = vperm.slane %v2074_v46, 5 }
  0xdf   :  { %1041 = vmatpush.bf16.msrb.mxu2 %v1293_v38  ;;  %1054 = vmatpush.bf16.msrb.mxu3 %v1517_v39 }
  0xe3   :  { %1042 = vmatpush.bf16.msrb.mxu2 %v1265_v44  ;;  %1055 = vmatpush.bf16.msrb.mxu3 %v1489_v45  ;;  %v293_v45 = vperm.slane %v2074_v46, 4 }
  0xe6   :  { %1043 = vmatmul.bf16.vlgmr.msrb.gmra.mxu2 %v2056_v30  ;;  %1056 = vmatmul.bf16.vlgmr.msrb.gmra.mxu3 %v2058_v35 }
 0x122   :  { %v914_v48 = vpop.f32.mrf.mxu0 }
 0x123   :  { %v915_v49 = vadd.f32 %v914_v48, %v290_v47  ;;  %v927_v50 = vpop.f32.mrf.mxu1 }
 0x125   :  { %v928_v51 = vadd.f32 %v927_v50, %v915_v49 }
 0x127   :  { %v1687_v53 = vmul.f32 -1.442695, %v928_v51 }
 0x128   :  { %v888_v54 = vpop.f32.mrf.mxu2 }
 0x129   :  { %1819 = vpow2.f32 %v1687_v53  ;;  %v889_v55 = vadd.f32 %v888_v54, %v289_v52  ;;  %v901_v56 = vpop.f32.mrf.mxu3 }
 0x12a   :  { %v916_v57 = vpop.f32.mrf.mxu0 }
 0x12b   :  { %v902_v58 = vadd.f32 %v901_v56, %v889_v55  ;;  %v929_v30 = vpop.f32.mrf.mxu1 }
 0x12d   :  { %v1686_v59 = vmul.f32 -1.442695, %v902_v58 }
 0x12f   :  { %v1820_v35 = vpop.eup %1819  ;;  %1821 = vpow2.f32 %v1686_v59 }
 0x130   :  { %v1083_v61 = vadd.f32 1.0, %v1820_v35  ;;  %v890_v62 = vpop.f32.mrf.mxu2 }
 0x131   :  { %v903_v63 = vpop.f32.mrf.mxu3 }
 0x132   :  { %1823 = vrcp.f32 %v1083_v61  ;;  %v966_v0 = vpop.f32.mrf.mxu0  ;;  %v1115_v17 = vand.u32 2147483648, %v1083_v61  ;;  %v1113_v19 = vand.u32 2147483647, %v1083_v61  ;;  %vm1109_vm2 = vweird.f32 %v1083_v61 }
 0x133   :  { %v967_v1 = vadd.f32 %v966_v0, %v292_v60  ;;  %v979_v2 = vpop.f32.mrf.mxu1 }
 0x134   :  { %v1116_v25 = vor.u32 1.1754944e-38, %v1115_v17  ;;  %vm1114_vm4 = vcmp.eq.f32.partialorder %v1113_v19, 8.507059e+37 }
 0x135   :  { %v1822_v3 = vpop.eup %1821  ;;  %v980_v4 = vadd.f32 %v979_v2, %v967_v1 }
 0x136   :  { %v1082_v6 = vadd.f32 1.0, %v1822_v3 }
 0x137   :  { %v1689_v7 = vmul.f32 -1.442695, %v980_v4 }
 0x138   :  { %v1824_v8 = vpop.eup %1823  ;;  %1825 = vrcp.f32 %v1082_v6  ;;  %v940_v9 = vpop.f32.mrf.mxu2  ;;  %v1100_v34 = vand.u32 2147483648, %v1082_v6  ;;  %v1098_v37 = vand.u32 2147483647, %v1082_v6  ;;  %vm1094_vm6 = vweird.f32 %v1082_v6 }
 0x139   :  { %v1105_v10 = vmul.f32 %v1824_v8, %v1083_v61  ;;  %1827 = vpow2.f32 %v1689_v7  ;;  %v941_v11 = vadd.f32 %v940_v9, %v291_v5  ;;  %v953_v12 = vpop.f32.mrf.mxu3  ;;  %vm1110_vm1 = vweird.f32 %v1824_v8 }
 0x13a   :  { %v968_v13 = vpop.f32.mrf.mxu0  ;;  %vm1111_vm3 = vmor %vm1109_vm2, %vm1110_vm1  ;;  %v1101_v43 = vor.u32 1.1754944e-38, %v1100_v34  ;;  %vm1099_vm8 = vcmp.eq.f32.partialorder %v1098_v37, 8.507059e+37 }
 0x13b   :  { %v1106_v14 = vsub.f32 1.0, %v1105_v10  ;;  %v954_v15 = vadd.f32 %v953_v12, %v941_v11  ;;  %v981_v16 = vpop.f32.mrf.mxu1 }
 0x13d   :  { %v1107_v18 = vmul.f32 %v1824_v8, %v1106_v14  ;;  %v1688_v20 = vmul.f32 -1.442695, %v954_v15 }
 0x13e   :  { %v1826_v21 = vpop.eup %1825 }
 0x13f   :  { %v1828_v22 = vpop.eup %1827  ;;  %v1108_v23 = vadd.f32 %v1824_v8, %v1107_v18  ;;  %v1090_v24 = vmul.f32 %v1826_v21, %v1082_v6  ;;  %1829 = vpow2.f32 %v1688_v20  ;;  %vm1095_vm5 = vweird.f32 %v1826_v21 }
 0x140   :  { %v1085_v26 = vadd.f32 1.0, %v1828_v22  ;;  %v942_v27 = vpop.f32.mrf.mxu2  ;;  %vm1096_vm7 = vmor %vm1094_vm6, %vm1095_vm5 }
 0x141   :  { %v1112_v28 = vsel %vm1111_vm3, %v1824_v8, %v1108_v23  ;;  %v1091_v29 = vsub.f32 1.0, %v1090_v24  ;;  %v955_v31 = vpop.f32.mrf.mxu3 }
 0x142   :  { %v1117_v33 = vsel %vm1114_vm4, %v1116_v25, %v1112_v28  ;;  %1831 = vrcp.f32 %v1085_v26  ;;  %v1145_v57 = vand.u32 2147483648, %v1085_v26  ;;  %v1143_v60 = vand.u32 2147483647, %v1085_v26 }
 0x143   :  { %1195 = vst [vmem:[#allocation11 + $0x8] sm:$0xff] %v1117_v33  ;;  %v1092_v36 = vmul.f32 %v1826_v21, %v1091_v29  ;;  %vm1139_vm10 = vweird.f32 %v1085_v26 }
 0x144   :  { %v1146_v1 = vor.u32 1.1754944e-38, %v1145_v57  ;;  %vm1144_vm12 = vcmp.eq.f32.partialorder %v1143_v60, 8.507059e+37 }
 0x145   :  { %v1018_v38 = vpop.f32.mrf.mxu0  ;;  %v1031_v39 = vpop.f32.mrf.mxu1  ;;  %v1093_v41 = vadd.f32 %v1826_v21, %v1092_v36 }
 0x146   :  { %v1830_v40 = vpop.eup %1829  ;;  %v1019_v42 = vadd.f32 %v1018_v38, %v294_v32  ;;  %v295_v32 = vperm.slane %v2074_v46, 6 }
 0x147   :  { %v1084_v44 = vadd.f32 1.0, %v1830_v40  ;;  %v1097_v47 = vsel %vm1096_vm7, %v1826_v21, %v1093_v41 }
 0x148   :  { %v1032_v48 = vadd.f32 %v1031_v39, %v1019_v42  ;;  %v1832_v49 = vpop.eup %1831  ;;  %v1102_v50 = vsel %vm1099_vm8, %v1101_v43, %v1097_v47 }
 0x149   :  { %1833 = vrcp.f32 %v1084_v44  ;;  %1194 = vst [vmem:[#allocation11] sm:$0xff] %v1102_v50  ;;  %v1135_v51 = vmul.f32 %v1832_v49, %v1085_v26  ;;  %v992_v53 = vpop.f32.mrf.mxu2  ;;  %v1005_v54 = vpop.f32.mrf.mxu3  ;;  %vm1140_vm9 = vweird.f32 %v1832_v49  ;;  %v1130_v8 = vand.u32 2147483648, %v1084_v44 }
 0x14a   :  { %v1691_v52 = vmul.f32 -1.442695, %v1032_v48  ;;  %v993_v55 = vadd.f32 %v992_v53, %v293_v45  ;;  %vm1141_vm11 = vmor %vm1139_vm10, %vm1140_vm9  ;;  %v1128_v11 = vand.u32 2147483647, %v1084_v44  ;;  %vm1124_vm14 = vweird.f32 %v1084_v44 }
 0x14b   :  { %v1136_v56 = vsub.f32 1.0, %v1135_v51  ;;  %v1131_v14 = vor.u32 1.1754944e-38, %v1130_v8 }
 0x14c   :  { %1835 = vpow2.f32 %v1691_v52  ;;  %v1006_v58 = vadd.f32 %v1005_v54, %v993_v55  ;;  %vm1129_vm0 = vcmp.eq.f32.partialorder %v1128_v11, 8.507059e+37 }
 0x14d   :  { %v1020_v30 = vpop.f32.mrf.mxu0  ;;  %v1033_v59 = vpop.f32.mrf.mxu1  ;;  %v1137_v35 = vmul.f32 %v1832_v49, %v1136_v56 }
 0x14e   :  { %v1690_v62 = vmul.f32 -1.442695, %v1006_v58 }
 0x14f   :  { %v1834_v61 = vpop.eup %1833  ;;  %v1138_v63 = vadd.f32 %v1832_v49, %v1137_v35 }
 0x150   :  { %v1120_v0 = vmul.f32 %v1834_v61, %v1084_v44  ;;  %1837 = vpow2.f32 %v1690_v62  ;;  %vm1125_vm13 = vweird.f32 %v1834_v61 }
 0x151   :  { %v1142_v3 = vsel %vm1141_vm11, %v1832_v49, %v1138_v63  ;;  %v994_v5 = vpop.f32.mrf.mxu2  ;;  %v1007_v6 = vpop.f32.mrf.mxu3  ;;  %vm1126_vm15 = vmor %vm1124_vm14, %vm1125_vm13 }
 0x152   :  { %v1836_v2 = vpop.eup %1835  ;;  %v1121_v4 = vsub.f32 1.0, %v1120_v0  ;;  %v1147_v7 = vsel %vm1144_vm12, %v1146_v1, %v1142_v3 }
 0x153   :  { %v1087_v9 = vadd.f32 1.0, %v1836_v2  ;;  %1197 = vst [vmem:[#allocation11 + $0x18] sm:$0xff] %v1147_v7 }
 0x154   :  { %v1122_v10 = vmul.f32 %v1834_v61, %v1121_v4 }
 0x155   :  { %1839 = vrcp.f32 %v1087_v9  ;;  %v1175_v21 = vand.u32 2147483648, %v1087_v9  ;;  %v1173_v24 = vand.u32 2147483647, %v1087_v9  ;;  %vm1169_vm2 = vweird.f32 %v1087_v9 }
 0x156   :  { %v1123_v12 = vadd.f32 %v1834_v61, %v1122_v10  ;;  %v1838_v13 = vpop.eup %1837 }
 0x157   :  { %v1086_v16 = vadd.f32 1.0, %v1838_v13  ;;  %v1176_v27 = vor.u32 1.1754944e-38, %v1175_v21  ;;  %vm1174_vm4 = vcmp.eq.f32.partialorder %v1173_v24, 8.507059e+37 }
 0x158   :  { %v1127_v15 = vsel %vm1126_vm15, %v1834_v61, %v1123_v12 }
 0x159   :  { %v1132_v17 = vsel %vm1129_vm0, %v1131_v14, %v1127_v15  ;;  %1841 = vrcp.f32 %v1086_v16  ;;  %v1160_v31 = vand.u32 2147483648, %v1086_v16  ;;  %v1158_v36 = vand.u32 2147483647, %v1086_v16 }
 0x15a   :  { %1196 = vst [vmem:[#allocation11 + $0x10] sm:$0xff] %v1132_v17  ;;  %vm1154_vm6 = vweird.f32 %v1086_v16 }
 0x15b   :  { %v1840_v18 = vpop.eup %1839  ;;  %v1161_v38 = vor.u32 1.1754944e-38, %v1160_v31  ;;  %vm1159_vm8 = vcmp.eq.f32.partialorder %v1158_v36, 8.507059e+37 }
 0x15c   :  { %v1165_v19 = vmul.f32 %v1840_v18, %v1087_v9  ;;  %vm1170_vm1 = vweird.f32 %v1840_v18 }
 0x15d   :  { %vm1171_vm3 = vmor %vm1169_vm2, %vm1170_vm1 }
 0x15e   :  { %v1166_v20 = vsub.f32 1.0, %v1165_v19 }
 0x15f   :  { %v1842_v22 = vpop.eup %1841 }
 0x160   :  { %v1167_v23 = vmul.f32 %v1840_v18, %v1166_v20  ;;  %v1150_v25 = vmul.f32 %v1842_v22, %v1086_v16  ;;  %vm1155_vm5 = vweird.f32 %v1842_v22 }
 0x161   :  { %vm1156_vm7 = vmor %vm1154_vm6, %vm1155_vm5 }
 0x162   :  { %v1168_v26 = vadd.f32 %v1840_v18, %v1167_v23  ;;  %v1151_v28 = vsub.f32 1.0, %v1150_v25 }
 0x164   :  { %v1172_v29 = vsel %vm1171_vm3, %v1840_v18, %v1168_v26  ;;  %v1152_v34 = vmul.f32 %v1842_v22, %v1151_v28 }
 0x165   :  { %v1177_v33 = vsel %vm1174_vm4, %v1176_v27, %v1172_v29 }
 0x166   :  { %1199 = vst [vmem:[#allocation11 + $0x28] sm:$0xff] %v1177_v33  ;;  %v1153_v37 = vadd.f32 %v1842_v22, %v1152_v34 }
 0x168   :  { %v1157_v41 = vsel %vm1156_vm7, %v1842_v22, %v1153_v37 }
 0x169   :  { %v1044_v39 = vpop.f32.mrf.mxu2  ;;  %v1057_v40 = vpop.f32.mrf.mxu3  ;;  %v1162_v43 = vsel %vm1159_vm8, %v1161_v38, %v1157_v41 }
 0x16a   :  { %v1045_v42 = vadd.f32 %v1044_v39, %v295_v32  ;;  %1198 = vst [vmem:[#allocation11 + $0x20] sm:$0xff] %v1162_v43 }
 0x16c   :  { %v1058_v44 = vadd.f32 %v1057_v40, %v1045_v42 }
 0x16e   :  { %v1692_v45 = vmul.f32 -1.442695, %v1058_v44 }
 0x170   :  { %1843 = vpow2.f32 %v1692_v45 }
 0x171   :  { %v1046_v46 = vpop.f32.mrf.mxu2  ;;  %v1059_v47 = vpop.f32.mrf.mxu3 }
 0x176   :  { %v1844_v48 = vpop.eup %1843 }
 0x177   :  { %v1088_v49 = vadd.f32 1.0, %v1844_v48 }
 0x179   :  { %1845 = vrcp.f32 %v1088_v49  ;;  %v1190_v53 = vand.u32 2147483648, %v1088_v49  ;;  %v1188_v55 = vand.u32 2147483647, %v1088_v49  ;;  %vm1184_vm10 = vweird.f32 %v1088_v49 }
 0x17b   :  { %v1191_v57 = vor.u32 1.1754944e-38, %v1190_v53  ;;  %vm1189_vm12 = vcmp.eq.f32.partialorder %v1188_v55, 8.507059e+37 }
 0x17f   :  { %v1846_v50 = vpop.eup %1845 }
 0x180   :  { %v1180_v51 = vmul.f32 %v1846_v50, %v1088_v49  ;;  %vm1185_vm9 = vweird.f32 %v1846_v50 }
 0x181   :  { %vm1186_vm11 = vmor %vm1184_vm10, %vm1185_vm9 }
 0x182   :  { %v1181_v52 = vsub.f32 1.0, %v1180_v51 }
 0x184   :  { %v1182_v54 = vmul.f32 %v1846_v50, %v1181_v52 }
 0x186   :  { %v1183_v56 = vadd.f32 %v1846_v50, %v1182_v54 }
 0x188   :  { %v1187_v58 = vsel %vm1186_vm11, %v1846_v50, %v1183_v56 }
 0x189   :  { %v1192_v30 = vsel %vm1189_vm12, %v1191_v57, %v1187_v58 }
 0x18a   :  { %1200 = vst [vmem:[#allocation11 + $0x30] sm:$0xff] %v1192_v30 }
 0x18b   :  { %1211 = dma.vmem_to_hbm [thread:$0]  %s1207_s4, 896, %s1209_s21, [#allocation4]  }
 0x18c   :  { %1997 = dma.done.wait [#allocation4], 896  }
 0x18d   :  { %1998 = vsyncadd [#allocation4], 4294966400 }
 0x18e   :  { %1216 = vsyncpa [#allocation3], 1 }
 0x18f   :  { %1217 = vsyncpa [#allocation6], 1 }
 0x190   :  { %1218 = vsyncpa [#allocation9], 1 }
 0x191   :  { %1219 = vsyncpa [#allocation4], 1 }

</bundles_post_ra>
